<compile_context>
chip_gen: v7x
topology: tpu7x:2x2x1
jax: 0.10.0
libtpu: 0.0.40
codegen_flags: <defaults>
</compile_context>

<pallas_src>
import functools
import warnings

import jax
import jax.numpy as jnp
from jax.experimental import pallas as pl
from jax.experimental.pallas import tpu as pltpu

_MiB = 1024 * 1024


def _layernorm_kernel(x_ref, gamma_ref, beta_ref, o_ref, *, eps, inv_d):
    x = x_ref[...].astype(jnp.float32)            # (tm, D)
    gamma = gamma_ref[...].astype(jnp.float32)    # (1, D)
    beta = beta_ref[...].astype(jnp.float32)      # (1, D)

    # Two-pass statistics: numerically robust (no E[x^2]-mean^2 cancellation)
    # and exactly matches torch's mean / var(unbiased=False).  The second pass
    # reads from vregs/VMEM, so it costs nothing extra at the HBM roofline.
    mean = jnp.sum(x, axis=-1, keepdims=True) * inv_d        # (tm, 1)
    xc = x - mean
    var = jnp.sum(xc * xc, axis=-1, keepdims=True) * inv_d   # biased variance
    inv_std = jax.lax.rsqrt(var + eps)                       # EUP (free slot)

    y = xc * inv_std * gamma + beta
    o_ref[...] = y.astype(o_ref.dtype)


def _vmem_capacity_bytes():
    """Physical VMEM of the attached TPU; falls back to 128 MiB (v5e/v6e)."""
    try:
        info = pltpu.get_tpu_info()
        cap = getattr(info, "vmem_capacity_bytes", None)
        if cap:
            return int(cap)
    except Exception:
        pass
    return 128 * _MiB


def _row_alignment(itemsize):
    # Sub-32-bit dtypes pack rows along sublanes: keep block boundaries on
    # fully-packed sublane tiles.
    return {4: 8, 2: 16, 1: 32}.get(int(itemsize), 8)


def _cdiv(a, b):
    return -(-a // b)


def _align_up(v, a):
    return _cdiv(v, a) * a


def _pick_row_tile(n_rows, d_model, itemsize, target_block_bytes, max_rows=8192):
    """Pick an aligned row tile giving a multi-MiB block with a balanced grid."""
    align = _row_alignment(itemsize)
    row_bytes = max(1, d_model * itemsize)

    tm = (target_block_bytes // row_bytes) // align * align
    tm = max(align, min(max_rows, tm))
    # No point tiling larger than the (sublane-rounded) whole input.
    tm = min(tm, _align_up(n_rows, align))

    # Keep >= 2 grid steps when possible so v7x megacore can split the rows.
    if n_rows > align and _cdiv(n_rows, tm) < 2:
        tm = max(align, _align_up(_cdiv(n_rows, 2), align))

    # For small grids, prefer an even step count so both v7x TensorCores get
    # equal work (an odd 3-step grid is up to ~33% imbalanced).
    steps = _cdiv(n_rows, tm)
    if 2 < steps <= 5 and steps % 2 == 1:
        tm_even = max(align, _align_up(_cdiv(n_rows, steps + 1), align))
        if _cdiv(n_rows, tm_even) % 2 == 0:
            tm = tm_even
    return tm


def _max_rows_for_budget(d_model, itemsize, budget_bytes, align):
    """Largest tm whose pipeline footprint (2*in + 2*out + ~3x f32) fits."""
    per_row = d_model * (2 * itemsize + 2 * itemsize + 3 * 4)
    param_and_slack = 4 * d_model * 4 + 4 * _MiB
    avail = max(budget_bytes - param_and_slack, per_row * align)
    tm_max = (avail // per_row) // align * align
    return max(align, tm_max)


def layer_norm(x, gamma, beta, eps=1e-12, row_tile=None, target_block_bytes=None):
    """x: (..., d_model); gamma/beta: (d_model,). Matches the torch LayerNorm.

    Performance notes:
      * Prefer bf16 I/O end-to-end — the kernel is HBM-bandwidth bound, so
        halving input+output bytes is ~2x wall clock.  Do NOT cast in the
        wrapper (extra HBM pass); compute is upcast to f32 inside the kernel.
      * Prefer d_model % 128 == 0 (lane-dense stores).
    """
    orig_shape = x.shape
    d_model = orig_shape[-1]
    x2d = x.reshape(-1, d_model)
    n_rows = x2d.shape[0]
    itemsize = jnp.dtype(x.dtype).itemsize
    align = _row_alignment(itemsize)

    if d_model % 128 != 0:
        warnings.warn(
            "layer_norm: d_model=%d is not a multiple of 128; output stores "
            "become masked partial stores (vst.msk). Prefer lane-dense d_model."
            % d_model)

    # Generation-aware VMEM budget and block-size target.
    vmem_cap = _vmem_capacity_bytes()
    if vmem_cap <= 64 * _MiB:           # v7x: 64 MiB physical per TC
        vmem_ceiling = 48 * _MiB        # leave pipeline headroom
        default_target = 6 * _MiB
    else:                               # v5e / v6e: 128 MiB physical
        vmem_ceiling = 100 * _MiB
        default_target = 12 * _MiB
    if target_block_bytes is None:
        target_block_bytes = default_target

    tm_budget = _max_rows_for_budget(d_model, itemsize, vmem_ceiling, align)
    if row_tile is not None:
        tm = max(align, min(int(row_tile), tm_budget))
    else:
        tm = _pick_row_tile(n_rows, d_model, itemsize, target_block_bytes)
        tm = min(tm, tm_budget)

    gamma2d = gamma.reshape(1, d_model)
    beta2d = beta.reshape(1, d_model)

    grid = (pl.cdiv(n_rows, tm),)

    # Scoped-VMEM budget: double-buffered input + output blocks, broadcast
    # params, plus headroom for the in-kernel f32 temporaries.
    io_block = tm * d_model * itemsize
    f32_block = tm * d_model * 4
    param_bytes = 2 * 2 * d_model * 4
    vmem_limit = (2 * io_block          # input double buffer
                  + 2 * io_block        # output double buffer
                  + param_bytes
                  + 3 * f32_block       # f32 temporaries (x, xc, y class)
                  + 4 * _MiB)           # slack
    vmem_limit = int(min(max(vmem_limit, 16 * _MiB), vmem_ceiling))

    kernel = functools.partial(_layernorm_kernel, eps=float(eps),
                               inv_d=1.0 / float(d_model))

    out = pl.pallas_call(
        kernel,
        out_shape=jax.ShapeDtypeStruct((n_rows, d_model), x.dtype),
        grid_spec=pltpu.PrefetchScalarGridSpec(
            num_scalar_prefetch=0,
            grid=grid,
            in_specs=[
                pl.BlockSpec((tm, d_model), lambda i: (i, 0)),
                pl.BlockSpec((1, d_model), lambda i: (0, 0)),
                pl.BlockSpec((1, d_model), lambda i: (0, 0)),
            ],
            out_specs=pl.BlockSpec((tm, d_model), lambda i: (i, 0)),
        ),
        compiler_params=pltpu.CompilerParams(
            dimension_semantics=("parallel",),
            vmem_limit_bytes=vmem_limit,
        ),
    )(x2d, gamma2d, beta2d)

    return out.reshape(orig_shape)


if __name__ == "__main__":
    # Module __init__(d_model) -> gamma=ones(d_model), beta=zeros(d_model),
    # eps=1e-12 (matches the referenced torch module, not nn.LayerNorm's 1e-5).
    batch, seq, d_model = 2, 8, 128
    eps = 1e-12

    key = jax.random.PRNGKey(0)
    x = jax.random.normal(key, (batch, seq, d_model), dtype=jnp.float32)

    gamma = jnp.ones((d_model,), dtype=jnp.float32)
    beta = jnp.zeros((d_model,), dtype=jnp.float32)

    out = layer_norm(x, gamma, beta, eps=eps)
    out = jax.block_until_ready(out)

    # Reference check in plain JAX (same math as the torch forward).
    mean = jnp.mean(x, axis=-1, keepdims=True)
    var = jnp.mean((x - mean) ** 2, axis=-1, keepdims=True)
    ref = gamma * (x - mean) / jnp.sqrt(var + eps) + beta
    assert jnp.allclose(out, ref, atol=1e-5, rtol=1e-5), "mismatch vs reference"

    print("KERNEL_OK")
</pallas_src>

<mosaic_0001>
module attributes {stable_mosaic.version = 11 : i64} {
  func.func @_layernorm_kernel(%arg0: i32, %arg1: memref<8x128xf32, #tpu.memory_space<vmem>>, %arg2: memref<1x128xf32, #tpu.memory_space<vmem>>, %arg3: memref<1x128xf32, #tpu.memory_space<vmem>>, %arg4: memref<8x128xf32, #tpu.memory_space<vmem>>) attributes {dimension_semantics = [#tpu.dimension_semantics<parallel>], iteration_bounds = array<i64: 2>, scalar_prefetch = 0 : i64, scratch_operands = 0 : i64, tpu.core_type = #tpu.core_type<tc>, window_params = [{transform_indices = @transform_0, window_bounds = array<i64: 8, 128>}, {pipeline_mode = #tpu.pipeline_mode<synchronous>, transform_indices = @transform_1, window_bounds = array<i64: 1, 128>}, {pipeline_mode = #tpu.pipeline_mode<synchronous>, transform_indices = @transform_2, window_bounds = array<i64: 1, 128>}, {transform_indices = @transform_3, window_bounds = array<i64: 8, 128>}]} {
    %c0 = arith.constant 0 : index
    %c0_0 = arith.constant 0 : index
    %0 = vector.load %arg1[%c0, %c0_0] : memref<8x128xf32, #tpu.memory_space<vmem>>, vector<8x128xf32>
    %c0_1 = arith.constant 0 : index
    %c0_2 = arith.constant 0 : index
    %1 = vector.load %arg2[%c0_1, %c0_2] : memref<1x128xf32, #tpu.memory_space<vmem>>, vector<1x128xf32>
    %c0_3 = arith.constant 0 : index
    %c0_4 = arith.constant 0 : index
    %2 = vector.load %arg3[%c0_3, %c0_4] : memref<1x128xf32, #tpu.memory_space<vmem>>, vector<1x128xf32>
    %cst = arith.constant dense<0.000000e+00> : vector<8xf32>
    %3 = vector.multi_reduction <add>, %0, %cst [1] : vector<8x128xf32> to vector<8xf32>
    %4 = vector.shape_cast %3 : vector<8xf32> to vector<8x1xf32>
    %cst_5 = arith.constant 7.812500e-03 : f32
    %5 = vector.broadcast %cst_5 : f32 to vector<8x1xf32>
    %6 = arith.mulf %4, %5 : vector<8x1xf32>
    %7 = vector.broadcast %6 : vector<8x1xf32> to vector<8x128xf32>
    %8 = arith.subf %0, %7 : vector<8x128xf32>
    %9 = arith.mulf %8, %8 : vector<8x128xf32>
    %cst_6 = arith.constant dense<0.000000e+00> : vector<8xf32>
    %10 = vector.multi_reduction <add>, %9, %cst_6 [1] : vector<8x128xf32> to vector<8xf32>
    %11 = vector.shape_cast %10 : vector<8xf32> to vector<8x1xf32>
    %cst_7 = arith.constant 7.812500e-03 : f32
    %12 = vector.broadcast %cst_7 : f32 to vector<8x1xf32>
    %13 = arith.mulf %11, %12 : vector<8x1xf32>
    %cst_8 = arith.constant 9.99999996E-13 : f32
    %14 = vector.broadcast %cst_8 : f32 to vector<8x1xf32>
    %15 = arith.addf %13, %14 : vector<8x1xf32>
    %16 = math.rsqrt %15 : vector<8x1xf32>
    %17 = vector.broadcast %16 : vector<8x1xf32> to vector<8x128xf32>
    %18 = arith.mulf %8, %17 : vector<8x128xf32>
    %19 = vector.broadcast %1 : vector<1x128xf32> to vector<8x128xf32>
    %20 = arith.mulf %18, %19 : vector<8x128xf32>
    %21 = vector.broadcast %2 : vector<1x128xf32> to vector<8x128xf32>
    %22 = arith.addf %20, %21 : vector<8x128xf32>
    %c0_9 = arith.constant 0 : index
    %c0_10 = arith.constant 0 : index
    %23 = vector.load %arg4[%c0_9, %c0_10] : memref<8x128xf32, #tpu.memory_space<vmem>>, vector<8x128xf32>
    tpu.vector_store %arg4[%c0_9, %c0_10], %22 {strides = array<i32>} : memref<8x128xf32, #tpu.memory_space<vmem>>, vector<8x128xf32>,
    return
  }
  func.func @transform_0(%arg0: i32) -> (i32, i32) {
    %c0_i32 = arith.constant 0 : i32
    %c0_i32_0 = arith.constant 0 : i32
    return %arg0, %c0_i32 : i32, i32
  }
  func.func @transform_1(%arg0: i32) -> (i32, i32) {
    %c0_i32 = arith.constant 0 : i32
    %c0_i32_0 = arith.constant 0 : i32
    %c0_i32_1 = arith.constant 0 : i32
    return %c0_i32, %c0_i32_0 : i32, i32
  }
  func.func @transform_2(%arg0: i32) -> (i32, i32) {
    %c0_i32 = arith.constant 0 : i32
    %c0_i32_0 = arith.constant 0 : i32
    %c0_i32_1 = arith.constant 0 : i32
    return %c0_i32, %c0_i32_0 : i32, i32
  }
  func.func @transform_3(%arg0: i32) -> (i32, i32) {
    %c0_i32 = arith.constant 0 : i32
    %c0_i32_0 = arith.constant 0 : i32
    return %arg0, %c0_i32 : i32, i32
  }
}

</mosaic_0001>

<bundles_post_ra>
// kernel: tpu_custom_call.1
= control target key start
LH: loop header
LB: loop body
LE: loop exit
PB: predicated region body
PF: predicated region fallthrough
CT: control target
= control target key end

     0   :  { %8 = vsyncpa [#allocation3], 0  ;;  %s648_s0 = inlined_call_operand.hbm [shape: f32[16,128], index: 0, kind: input, shape index: {}]   ;;  %s649_s1 = inlined_call_operand.vmem [shape: f32[1,128], index: 1, kind: input, shape index: {}]   ;;  %s650_s2 = inlined_call_operand.vmem [shape: f32[1,128], index: 2, kind: input, shape index: {}]   ;;  %s651_s3 = inlined_call_operand.hbm [shape: f32[16,128], index: 3, kind: output, shape index: {}]  }
   0x1   :  { %10 = vsyncpa [#allocation3 + $0x1], 0 }
   0x2   :  { %11 = vsyncpa [#allocation4], 0 }
   0x3   :  { %13 = vsyncpa [#allocation4 + $0x1], 0  ;;  %s481_s12 = smov 0   ;;  %s483_s13 = smov 0  }
   0x4   :  { %s485_s14 = smov 0   ;;  %s487_s15 = smov 0  }
   0x5 LB: > { %s502_s16 = sadd.s32 4294967295, %s457_s15   ;;  %s299_s17 = sadd.s32 4294967294, %s457_s15   ;;  %s457_s15 = sphi %s487_s15, %s666_s15   ;;  %s453_s14 = sphi %s485_s14, %s665_s14   ;;  %s449_s13 = sphi %s483_s13, %s664_s13   ;;  %s445_s12 = sphi %s481_s12, %s663_s12  }
   0x6   : > { %s506_s18 = sadd.s32 1, %s457_s15   ;;  %s26_s19 = sadd.s32 1, %s453_s14 }
   0x7   : > { %s23_s20 = ssub.s32 %s457_s15, %s506_s18  ;;  %p33_p0 = scmp.ne.s32.totalorder %s453_s14, %s449_s13 }
   0x8   : > { %p24_p1 = scmp.eq.s32.totalorder %s23_s20, 0  ;;  %p34_p2 = scmp.eq.s32.totalorder %s457_s15, 0 }
   0x9   : > { %p39_p3 = scmp.ne.s32.totalorder %s449_s13, %s445_s12  ;;  %p40_p4 = scmp.eq.s32.totalorder %s502_s16, 0 }
   0xa   : > { %s518_s21 = scalar_select %p24_p1, %s453_s14, %s26_s19  }
   0xb   : > { %p520_p5 = por %p34_p2, %p33_p0  ;;  %p524_p6 = por %p40_p4, %p39_p3 }
   0xc   : > { %p105_p7 = scmp.eq.s32.totalorder %s502_s16, 1  ;;  %p111_p8 = scmp.eq.s32.totalorder %s299_s17, 1 }
   0xd   : > { %p325_p10 = scmp.lt.s32.totalorder %s457_s15, 2  ;;  %s137_s26 = sand.u32 1, %s453_s14  }
   0xe   : > { %p531_p11 = por %p105_p7, %p33_p0  ;;  %p535_p12 = por %p111_p8, %p39_p3 }
   0xf   : > { %s303_s27 = sshll.u32 %s457_s15, 7  ;;  %s302_s28 = sshll.u32 %s137_s26, 3 }
  0x10   : > { %s655_s24 = scalar_select %p531_p11, 1, 0 }
  0x11   : > { %s656_s25 = scalar_select %p535_p12, 1, 0 }
  0x12   : > { %s544_s4 = scalar_lea.hbm %s648_s0, %s303_s27  ;;  %s141_s5 = scalar_lea.vmem [#allocation2], %s302_s28 }
  0x13   : > { %s148_s6 = sshll.u32 %s141_s5, 4  ;;  %p548_p13 = pnand %p325_p10, %p520_p5  ;;  %s552_s6 = int_to_ptr.vmem [resolvable:$true] %s148_s6 }
  0x14   : > { %s138_s8 = scalar_lea.sflag [#allocation3], %s137_s26  ;;  %s361_s9 = scalar_lea.hbm %s544_s4, 128 }
  0x15   : > { %p362_p2 = scmp.ne.s32.totalorder %s544_s4, %s361_s9  ;;  %p363_p3 = pneg %p548_p13 }
  0x16   : > { %s366_s17 = scalar_lea.hbm %s648_s0, 256  ;;  %p367_p5 = scmp.lt.u32.totalorder %s544_s4, %s648_s0 }
  0x17   : > { %p364_p4 = pnand %p363_p3, %p362_p2  ;;  %p368_p8 = scmp.lt.u32.totalorder %s366_s17, %s361_s9 }
  0x18   : > { %p370_p9 = scmp.lt.u32.totalorder %s361_s9, %s544_s4 }
  0x19   : > { %p365_p7 = pneg %p364_p4  ;;  %p369_p10 = por %p368_p8, %p367_p5 }
  0x1b   : > { %p371_p0 = por %p370_p9, %p369_p10 }
  0x1d   : > { %p372_p1 = pnand %p371_p0, %p365_p7 }
  0x1f   : > { %375 = shalt.err (!%p372_p1)
}
  0x20   : > { %s376_s22 = scalar_lea.vmem %s552_s6, 128  ;;  %s459_s26 = smov [#allocation2]  }
  0x21   : > { %p377_p2 = scmp.ne.s32.totalorder %s552_s6, %s376_s22  ;;  %s381_s27 = sshll.u32 %s459_s26, 4  ;;  %s382_s27 = int_to_ptr.vmem [resolvable:$false] %s381_s27 }
  0x22   : > { %s383_s28 = scalar_lea.vmem %s382_s27, 256  ;;  %p384_p11 = scmp.lt.s32.totalorder %s552_s6, %s382_s27 }
  0x23   : > { %p379_p4 = pnand %p377_p2, %p363_p3  ;;  %p385_p5 = scmp.lt.s32.totalorder %s383_s28, %s376_s22 }
  0x25   : > { %p380_p12 = pneg %p379_p4  ;;  %p386_p8 = por %p385_p5, %p384_p11 }
  0x27   : > { %p387_p9 = pnand %p386_p8, %p380_p12 }
  0x29   : > { %390 = shalt.err (!%p387_p9)
}
  0x2a   : > { %320 = dma.hbm_to_vmem [thread:$0]  (!%p548_p13), %s544_s4, 128, %s552_s6, %s138_s8  }
  0x2b   : > { %p658_p0 = scmp.lt.s32.totalorder %s457_s15, 3  ;;  %p659_p1 = scmp.ge.s32.totalorder %s457_s15, 1 }
  0x2d   : > { %p154_p3 = pnand %p659_p1, %p658_p0 }
  0x2e   : > { %s586_s29 = sand.u32 (!%p154_p3), 1, %s449_s13  }
  0x2f   : > { %157 = sbr.rel (%p154_p3) target bundleno = 381 (0x17d), region = 32  ;;  %s305_s30 = sshll.u32 (!%p154_p3), %s586_s29, 3 }
  0x30   : > { %s160_s5 = scalar_lea.sflag (!%p154_p3), [#allocation3], %s586_s29  ;;  %s163_s9 = scalar_lea.vmem (!%p154_p3), [#allocation2], %s305_s30 }
  0x36   : > { %436 = dma.done.wait (%p524_p6), %s160_s5, 128  }
  0x37   : > { %438 = vsyncadd (%p524_p6), %s160_s5, 4294967168  ;;  %v186_v0 = vld [vmem:[%s163_s9] sm:$0xff]  ;;  %s310_s8 = sshll.u32 %s502_s16, 7  ;;  %s185_s10 = scalar_lea.vmem [#allocation5], %s305_s30 }
  0x38   : > { %189 = vadd.xlane.f32.xlu0 %v186_v0  ;;  %v307_v9 = vld [vmem:[%s649_s1] ss:$0 sm:$0xff]  ;;  %s229_s11 = sshll.u32 %s185_s10, 4  ;;  %s604_s20 = scalar_lea.hbm %s651_s3, %s310_s8  ;;  %s606_s11 = int_to_ptr.vmem [resolvable:$true] %s229_s11 }
  0x39   : > { %v308_v11 = vld [vmem:[%s650_s2] ss:$0 sm:$0xff]  ;;  %s216_s22 = scalar_lea.sflag [#allocation4], %s586_s29  ;;  %s391_s26 = scalar_lea.vmem %s606_s11, 128 }
  0x3a   : > { %p392_p6 = scmp.ne.s32.totalorder %s606_s11, %s391_s26  ;;  %p660_p11 = scmp.ne.s32.totalorder %s655_s24, 0 }
  0x3b   : > { %s460_s16 = smov [#allocation5]  }
  0x3c   : > { %p393_p12 = pnand %p392_p6, %p660_p11  ;;  %s395_s27 = sshll.u32 %s460_s16, 4  ;;  %s396_s27 = int_to_ptr.vmem [resolvable:$false] %s395_s27 }
  0x3d   : > { %s397_s28 = scalar_lea.vmem %s396_s27, 256  ;;  %p398_p7 = scmp.lt.s32.totalorder %s606_s11, %s396_s27 }
  0x3e   : > { %p394_p13 = pneg %p393_p12  ;;  %p399_p10 = scmp.lt.s32.totalorder %s397_s28, %s391_s26 }
  0x40   : > { %p400_p2 = por %p399_p10, %p398_p7 }
  0x42   : > { %p401_p4 = pnand %p400_p2, %p394_p13 }
  0xc5   : > { %v190_v1 = vpop.xlane.xlu0 %189 }
  0xc6   : > { %v191_v2 = vmul.f32 0.0078125, %v190_v1 }
  0xc8   : > { %v192_v3 = vsub.f32 %v186_v0, %v191_v2 }
  0xca   : > { %v193_v4 = vmul.f32 %v192_v3, %v192_v3 }
  0xcc   : > { %194 = vadd.xlane.f32.xlu0 %v193_v4 }
 0x159   : > { %v195_v5 = vpop.xlane.xlu0 %194 }
 0x15a   : > { %v196_v6 = vmul.f32 0.0078125, %v195_v5 }
 0x15c   : > { %v197_v7 = vadd.f32 1e-12, %v196_v6 }
 0x15e   : > { %359 = vrsqrt.f32 %v197_v7 }
 0x168   : > { %v360_v8 = vpop.eup %359 }
 0x169   : > { %v199_v10 = vmul.f32 %v360_v8, %v192_v3 }
 0x16b   : > { %v206_v12 = vmul.f32 %v307_v9, %v199_v10 }
 0x16d   : > { %v213_v13 = vadd.f32 %v308_v11, %v206_v12 }
 0x16f   : > { %214 = vst [vmem:[%s185_s10] sm:$0xff] %v213_v13 }
 0x170   : > { %404 = shalt.err (!%p401_p4)
}
 0x171   : > { %s405_s29 = scalar_lea.hbm %s604_s20, 128  ;;  %s409_s9 = scalar_lea.hbm %s651_s3, 256 }
 0x172   : > { %p406_p5 = scmp.ne.s32.totalorder %s604_s20, %s405_s29  ;;  %p410_p0 = scmp.lt.u32.totalorder %s604_s20, %s651_s3 }
 0x173   : > { %p411_p1 = scmp.lt.u32.totalorder %s409_s9, %s405_s29  ;;  %p413_p6 = scmp.lt.u32.totalorder %s405_s29, %s604_s20 }
 0x174   : > { %p407_p8 = pnand %p406_p5, %p660_p11 }
 0x175   : > { %p412_p3 = por %p411_p1, %p410_p0 }
 0x176   : > { %p408_p9 = pneg %p407_p8 }
 0x177   : > { %p414_p12 = por %p413_p6, %p412_p3 }
 0x179   : > { %p415_p13 = pnand %p414_p12, %p408_p9 }
 0x17b   : > { %418 = shalt.err (!%p415_p13)
}
 0x17c   : > { %315 = dma.vmem_to_hbm [thread:$0]  (%p660_p11), %s606_s11, 128, %s604_s20, %s216_s22  }
 0x17d PF: > { %s241_s23 = sand.u32 1, %s445_s12   ;;  %p661_p7 = scmp.ne.s32.totalorder %s656_s25, 0 }
 0x17e   : > { %p662_p10 = scmp.ge.s32.totalorder %s457_s15, 2  ;;  %s242_s7 = scalar_lea.sflag [#allocation4], %s241_s23 }
 0x180   : > { %p322_p2 = pnand %p662_p10, %p661_p7 }
 0x182   : > { %440 = dma.done.wait (!%p322_p2), %s242_s7, 128  }
 0x183   : > { %442 = vsyncadd (!%p322_p2), %s242_s7, 4294967168  ;;  %p16_p4 = scmp.ge.s32.totalorder %s506_s18, 4   ;;  %s663_s12 = smov %s449_s13 }
 0x184   : > { %s664_s13 = smov %s453_s14  ;;  %s665_s14 = smov %s518_s21 }
 0x185   : > { %s666_s15 = smov %s506_s18  ;;  %18 = sbr.rel (!%p16_p4) target bundleno = 5 (0x5), region = 77 }
 0x18c   :  { %247 = vsyncpa [#allocation3], 1 }
 0x18d   :  { %249 = vsyncpa [#allocation3 + $0x1], 1 }
 0x18e   :  { %250 = vsyncpa [#allocation4], 1 }
 0x18f   :  { %252 = vsyncpa [#allocation4 + $0x1], 1 }

</bundles_post_ra>
